<compile_context>
chip_gen: v7x
topology: tpu7x:2x2x1
jax: 0.10.0
libtpu: 0.0.40
codegen_flags: <defaults>
</compile_context>

<pallas_src>
import jax
import jax.numpy as jnp
from jax.experimental import pallas as pl
from jax.experimental.pallas import tpu as pltpu


# ----------------------------- hardware queries -----------------------------
def _device_kind() -> str:
    try:
        return jax.devices()[0].device_kind.lower()
    except Exception:
        return ""


def _vmem_capacity() -> int:
    """Per-TensorCore VMEM capacity in bytes (conservative fallback)."""
    try:
        cap = int(getattr(pltpu.get_tpu_info(), "vmem_capacity_bytes", 0))
        if cap > 0:
            return cap
    except Exception:
        pass
    kind = _device_kind()
    if "v5" in kind or "v6" in kind:
        return 128 << 20
    return 64 << 20          # v7x / unknown: be conservative


def _group_cap(itemsize: int) -> int:
    """Max groups per slab row so the f32-HIGHEST segment matmuls stay below the
    HBM roofline (segment-sum cost ~ 2*G FLOP per input byte)."""
    kind = _device_kind()
    if "v5" in kind:
        base = 32
    elif "v7" in kind:
        base = 48
    elif "v6" in kind:
        base = 64
    else:
        base = 32
    return max(8, (base * itemsize) // 4)   # narrower dtypes halve HBM bytes


# ------------------------------ tiling helpers -------------------------------
def _sublane(itemsize: int) -> int:
    return {1: 32, 2: 16, 4: 8}.get(itemsize, 8)


def _round_up(x: int, m: int) -> int:
    return ((x + m - 1) // m) * m


def _padded_bytes(shape, itemsize: int) -> int:
    """VMEM footprint of a block after (sublane, 128-lane) padding."""
    shape = tuple(shape)
    if len(shape) == 1:
        shape = (1,) + shape
    lead = 1
    for d in shape[:-2]:
        lead *= int(d)
    s = _round_up(max(1, int(shape[-2])), _sublane(itemsize))
    l = _round_up(max(1, int(shape[-1])), 128)
    return lead * s * l * itemsize


def _pick_rows(n_rows: int, bytes_per_row: int, sub: int, target_bytes: int) -> int:
    """Rows per block: ~target_bytes per buffer, sublane-aligned, >=4 grid steps
    when there is enough work (2 pipelined steps per v7x TensorCore)."""
    if n_rows <= sub:
        return max(1, n_rows)
    rows = max(1, target_bytes // max(1, bytes_per_row))
    rows = min(rows, n_rows)
    rows = max(sub, (rows // sub) * sub)
    min_steps = 4
    if n_rows >= min_steps * sub:
        step_rows = max(sub, (((n_rows + min_steps - 1) // min_steps) // sub) * sub)
        rows = min(rows, step_rows)
    return int(rows)


def _plan(n_rows: int, lanes: int, itemsize: int, row_affine: bool,
          resident_bytes: int, capacity: int):
    """Pick rows-per-block and an explicit vmem_limit that covers the real
    working set (padded blocks x2 buffers + affine + residents + f32 temps)."""
    sub = _sublane(itemsize)
    target = (4 << 20) if capacity <= (64 << 20) else (6 << 20)
    rows = _pick_rows(n_rows, lanes * itemsize, sub, target)
    cap = max(16 << 20, capacity - (12 << 20))   # headroom for compiler scratch
    while True:
        blk = _padded_bytes((rows, lanes), itemsize)
        if row_affine:
            affine = 2 * _padded_bytes((rows, 1), 4)
        else:
            affine = 2 * _padded_bytes((1, lanes), 4)
        f32blk = _padded_bytes((rows, lanes), 4)
        budget = 2 * (2 * blk + affine + resident_bytes) + 3 * f32blk + (4 << 20)
        if budget <= cap or rows <= sub:
            break
        rows = max(sub, ((rows // 2) // sub) * sub)
    vmem = int(min(max(budget, min(32 << 20, cap)), cap))
    return rows, vmem


def _waste(lanes: int) -> float:
    p = _round_up(lanes, 128)
    return (p - lanes) / p


def _choose_groups(L: int, divisor_of: int, itemsize: int) -> int:
    """Pick G groups of length L per lane-dense slab row (G must divide
    `divisor_of`). Returns 1 when the plain path is already lane-efficient or
    grouping is not worth the MXU segment-sum cost."""
    base = _waste(L)
    if base < 0.125:
        return 1
    cap = _group_cap(itemsize)
    best_g, best_w = 1, base
    for g in range(2, min(cap, max(1, divisor_of)) + 1):
        if divisor_of % g:
            continue
        lanes = g * L
        if lanes > 4096:
            break
        if lanes * g * 4 > (2 << 20):      # segment matrix must stay tiny in VMEM
            break
        w = _waste(lanes)
        if w < best_w - 1e-9:              # strict '<' => smallest g with min waste
            best_w, best_g = w, g
    if best_g > 1 and (best_w <= 0.5 * base or best_w < 0.05):
        return best_g
    return 1


# --------------------------------- kernels -----------------------------------
def _make_plain_kernel(eps: float, L: int):
    """x block (TB, L); normalize each row over L. w/b broadcast from either
    (1, L) (per-feature) or (TB, 1) (per-row scalar)."""
    inv = 1.0 / float(L)

    def kernel(x_ref, w_ref, b_ref, o_ref):
        x = x_ref[...].astype(jnp.float32)
        mean = jnp.sum(x, axis=-1, keepdims=True) * inv
        dx = x - mean
        var = jnp.sum(dx * dx, axis=-1, keepdims=True) * inv
        rstd = jax.lax.rsqrt(var + eps)
        w = w_ref[...].astype(jnp.float32)
        b = b_ref[...].astype(jnp.float32)
        o_ref[...] = ((dx * rstd) * w + b).astype(o_ref.dtype)

    return kernel


def _make_grouped_kernel(eps: float, L: int):
    """x block (TB, G*L): G length-L groups per row. Per-group reduction and
    broadcast-back via 0/1 segment matrices on the MXU (HIGHEST precision for
    f32 accuracy) so every load/store stays lane-dense."""
    inv = 1.0 / float(L)
    hi = jax.lax.Precision.HIGHEST

    def kernel(x_ref, w_ref, b_ref, s_ref, st_ref, o_ref):
        x = x_ref[...].astype(jnp.float32)                     # (TB, G*L)
        S = s_ref[...]                                         # (G*L, G)
        ST = st_ref[...]                                       # (G, G*L)
        mean = jnp.dot(x, S, precision=hi,
                       preferred_element_type=jnp.float32) * inv          # (TB, G)
        mean_full = jnp.dot(mean, ST, precision=hi,
                            preferred_element_type=jnp.float32)           # (TB, G*L)
        dx = x - mean_full
        var = jnp.dot(dx * dx, S, precision=hi,
                      preferred_element_type=jnp.float32) * inv
        rstd = jax.lax.rsqrt(var + eps)
        rstd_full = jnp.dot(rstd, ST, precision=hi,
                            preferred_element_type=jnp.float32)
        w = w_ref[...].astype(jnp.float32)                     # (TB,1) or (1,G*L)
        b = b_ref[...].astype(jnp.float32)
        o_ref[...] = ((dx * rstd_full) * w + b).astype(o_ref.dtype)

    return kernel


# ------------------------------ pallas_call wrappers --------------------------
def _plain_call(x2, w, b, eps):
    M2, L = x2.shape
    itemsize = x2.dtype.itemsize
    capacity = _vmem_capacity()
    row_affine = (w.shape[0] != 1)
    rows, vmem = _plan(M2, L, itemsize, row_affine, 0, capacity)

    if row_affine:
        wspec = pl.BlockSpec((rows, 1), lambda i: (i, 0))
    else:
        wspec = pl.BlockSpec((1, L), lambda i: (0, 0))

    return pl.pallas_call(
        _make_plain_kernel(float(eps), int(L)),
        out_shape=jax.ShapeDtypeStruct((M2, L), x2.dtype),
        grid=(pl.cdiv(M2, rows),),
        in_specs=[pl.BlockSpec((rows, L), lambda i: (i, 0)), wspec, wspec],
        out_specs=pl.BlockSpec((rows, L), lambda i: (i, 0)),
        compiler_params=pltpu.CompilerParams(
            dimension_semantics=("parallel",),
            vmem_limit_bytes=vmem),
    )(x2, w, b)


def _grouped_call(x2, w, b, eps, L, G):
    M2, lanes = x2.shape                    # lanes == G * L
    itemsize = x2.dtype.itemsize
    capacity = _vmem_capacity()
    row_affine = (w.shape[0] != 1)

    # 0/1 segment matrices (resident across the grid: constant index_map).
    seg = (jnp.arange(lanes, dtype=jnp.int32)[:, None] // L
           == jnp.arange(G, dtype=jnp.int32)[None, :]).astype(jnp.float32)
    segT = jnp.transpose(seg)
    resident = _padded_bytes((lanes, G), 4) + _padded_bytes((G, lanes), 4)

    rows, vmem = _plan(M2, lanes, itemsize, row_affine, resident, capacity)

    if row_affine:
        wspec = pl.BlockSpec((rows, 1), lambda i: (i, 0))
    else:
        wspec = pl.BlockSpec((1, lanes), lambda i: (0, 0))

    return pl.pallas_call(
        _make_grouped_kernel(float(eps), int(L)),
        out_shape=jax.ShapeDtypeStruct((M2, lanes), x2.dtype),
        grid=(pl.cdiv(M2, rows),),
        in_specs=[pl.BlockSpec((rows, lanes), lambda i: (i, 0)),
                  wspec, wspec,
                  pl.BlockSpec((lanes, G), lambda i: (0, 0)),
                  pl.BlockSpec((G, lanes), lambda i: (0, 0))],
        out_specs=pl.BlockSpec((rows, lanes), lambda i: (i, 0)),
        compiler_params=pltpu.CompilerParams(
            dimension_semantics=("parallel",),
            vmem_limit_bytes=vmem),
    )(x2, w, b, seg, segT)


# ------------------------------ public entry points ---------------------------
def layer_norm_channels_last(x, weight, bias, eps):
    """F.layer_norm over the trailing feature dim (per-feature affine)."""
    orig_shape = x.shape
    D = int(orig_shape[-1])
    xr = x.reshape(-1, D)
    R = int(xr.shape[0])
    weight = weight.reshape(-1)
    bias = bias.reshape(-1)

    G = _choose_groups(D, R, x.dtype.itemsize)   # G must divide R
    if G > 1:
        x2 = xr.reshape(R // G, G * D)           # contiguous -> free reshape
        w2 = jnp.tile(weight, G).reshape(1, G * D)
        b2 = jnp.tile(bias, G).reshape(1, G * D)
        out = _grouped_call(x2, w2, b2, eps, D, G).reshape(R, D)
    else:
        out = _plain_call(xr, weight.reshape(1, D), bias.reshape(1, D), eps)
    return out.reshape(orig_shape)


def layer_norm_channels_first(x, weight, bias, eps):
    """NCHW input; mean/var over the LAST axis (W) only (exactly x.mean(-1) as
    in the PyTorch forward), per-channel affine."""
    assert x.ndim == 4, "channels_first path expects NCHW input"
    N, C, H, W = (int(d) for d in x.shape)
    weight = weight.reshape(-1)
    bias = bias.reshape(-1)

    # G consecutive h-rows of one (n, c) per slab row so the per-row affine is a
    # single channel scalar; G must divide H.
    G = _choose_groups(W, H, x.dtype.itemsize)
    M2 = N * C * (H // G)
    g = jnp.repeat(jnp.tile(weight, N), H // G).reshape(M2, 1)   # row -> weight[c]
    b = jnp.repeat(jnp.tile(bias, N), H // G).reshape(M2, 1)
    x2 = x.reshape(M2, G * W)

    if G > 1:
        out = _grouped_call(x2, g, b, eps, W, G)
    else:
        out = _plain_call(x2, g, b, eps)
    return out.reshape(N, C, H, W)


# ------------------------------ module-like wrapper ----------------------------
class LayerNorm:
    def __init__(self, normalized_shape, eps=1e-6, data_format="channels_last"):
        if data_format not in ("channels_last", "channels_first"):
            raise NotImplementedError
        if isinstance(normalized_shape, int):
            normalized_shape = (normalized_shape,)
        # TODO(synk): the original PyTorch forward reads self.normalized_shape,
        # which its __init__ never sets (latent bug); we define it from the arg.
        self.normalized_shape = tuple(normalized_shape)
        assert len(self.normalized_shape) == 1, "only 1-D normalized_shape supported"
        self.weight = jnp.ones(self.normalized_shape, jnp.float32)
        self.bias = jnp.zeros(self.normalized_shape, jnp.float32)
        self.eps = eps
        self.data_format = data_format

    def __call__(self, x):
        if self.data_format == "channels_last":
            return layer_norm_channels_last(x, self.weight, self.bias, self.eps)
        return layer_norm_channels_first(x, self.weight, self.bias, self.eps)


# ------------------------------ pure-JAX references ---------------------------
def _ref_channels_first(x, w, b, eps):
    u = x.mean(-1, keepdims=True)
    s = ((x - u) ** 2).mean(-1, keepdims=True)
    xh = (x - u) / jnp.sqrt(s + eps)
    return w[:, None, None] * xh + b[:, None, None]


def _ref_channels_last(x, w, b, eps):
    u = x.mean(-1, keepdims=True)
    s = ((x - u) ** 2).mean(-1, keepdims=True)
    xh = (x - u) / jnp.sqrt(s + eps)
    return xh * w + b


if __name__ == "__main__":
    key = jax.random.PRNGKey(0)
    k1, k2, k3, k4 = jax.random.split(key, 4)

    N, C, H, W = 2, 4, 16, 16

    # ---- channels_first (NCHW input, per-channel affine, stats over W) ----
    ln_cf = LayerNorm(C, eps=1e-6, data_format="channels_first")
    ln_cf.weight = jax.random.normal(k2, (C,), jnp.float32)
    ln_cf.bias = jax.random.normal(k3, (C,), jnp.float32)
    x_cf = jax.random.normal(k1, (N, C, H, W), jnp.float32)

    y_cf = jax.block_until_ready(ln_cf(x_cf))
    y_cf_ref = _ref_channels_first(x_cf, ln_cf.weight, ln_cf.bias, ln_cf.eps)
    assert y_cf.shape == x_cf.shape and y_cf.dtype == x_cf.dtype
    assert jnp.allclose(y_cf, y_cf_ref, atol=1e-4, rtol=1e-4)

    # ---- channels_last (NHWC input, normalize over trailing C) ----
    ln_cl = LayerNorm(C, eps=1e-6, data_format="channels_last")
    ln_cl.weight = jax.random.normal(k2, (C,), jnp.float32)
    ln_cl.bias = jax.random.normal(k3, (C,), jnp.float32)
    x_cl = jax.random.normal(k4, (N, H, W, C), jnp.float32)

    y_cl = jax.block_until_ready(ln_cl(x_cl))
    y_cl_ref = _ref_channels_last(x_cl, ln_cl.weight, ln_cl.bias, ln_cl.eps)
    assert y_cl.shape == x_cl.shape and y_cl.dtype == x_cl.dtype
    assert jnp.allclose(y_cl, y_cl_ref, atol=1e-4, rtol=1e-4)

    print("KERNEL_OK")
</pallas_src>

<mosaic_0001>
module attributes {stable_mosaic.version = 11 : i64} {
  func.func @kernel(%arg0: i32, %arg1: memref<16x128xf32, #tpu.memory_space<vmem>>, %arg2: memref<16x1xf32, #tpu.memory_space<vmem>>, %arg3: memref<16x1xf32, #tpu.memory_space<vmem>>, %arg4: memref<128x8xf32, #tpu.memory_space<vmem>>, %arg5: memref<8x128xf32, #tpu.memory_space<vmem>>, %arg6: memref<16x128xf32, #tpu.memory_space<vmem>>) attributes {dimension_semantics = [#tpu.dimension_semantics<parallel>], iteration_bounds = array<i64: 1>, scalar_prefetch = 0 : i64, scratch_operands = 0 : i64, tpu.core_type = #tpu.core_type<tc>, window_params = [{transform_indices = @transform_0, window_bounds = array<i64: 16, 128>}, {transform_indices = @transform_1, window_bounds = array<i64: 16, 1>}, {transform_indices = @transform_2, window_bounds = array<i64: 16, 1>}, {pipeline_mode = #tpu.pipeline_mode<synchronous>, transform_indices = @transform_3, window_bounds = array<i64: 128, 8>}, {pipeline_mode = #tpu.pipeline_mode<synchronous>, transform_indices = @transform_4, window_bounds = array<i64: 8, 128>}, {transform_indices = @transform_5, window_bounds = array<i64: 16, 128>}]} {
    %c0 = arith.constant 0 : index
    %c0_0 = arith.constant 0 : index
    %0 = vector.load %arg1[%c0, %c0_0] : memref<16x128xf32, #tpu.memory_space<vmem>>, vector<16x128xf32>
    %c0_1 = arith.constant 0 : index
    %c0_2 = arith.constant 0 : index
    %1 = vector.load %arg4[%c0_1, %c0_2] : memref<128x8xf32, #tpu.memory_space<vmem>>, vector<128x8xf32>
    %c0_3 = arith.constant 0 : index
    %c0_4 = arith.constant 0 : index
    %2 = vector.load %arg5[%c0_3, %c0_4] : memref<8x128xf32, #tpu.memory_space<vmem>>, vector<8x128xf32>
    %cst = arith.constant dense<0.000000e+00> : vector<16x8xf32>
    %3 = tpu.matmul %0, %1, %cst {dimension_numbers = #tpu.dot_dimension_numbers<[1], [0], [0], [1], [0, 0, 1, 1], [], []>, precision = #tpu.contract_precision<fp32>} : vector<16x128xf32>, vector<128x8xf32>, vector<16x8xf32> -> vector<16x8xf32>
    %cst_5 = arith.constant 6.250000e-02 : f32
    %4 = vector.broadcast %cst_5 : f32 to vector<16x8xf32>
    %5 = arith.mulf %3, %4 : vector<16x8xf32>
    %cst_6 = arith.constant dense<0.000000e+00> : vector<16x128xf32>
    %6 = tpu.matmul %5, %2, %cst_6 {dimension_numbers = #tpu.dot_dimension_numbers<[1], [0], [0], [1], [0, 0, 1, 1], [], []>, precision = #tpu.contract_precision<fp32>} : vector<16x8xf32>, vector<8x128xf32>, vector<16x128xf32> -> vector<16x128xf32>
    %7 = arith.subf %0, %6 : vector<16x128xf32>
    %8 = arith.mulf %7, %7 : vector<16x128xf32>
    %cst_7 = arith.constant dense<0.000000e+00> : vector<16x8xf32>
    %9 = tpu.matmul %8, %1, %cst_7 {dimension_numbers = #tpu.dot_dimension_numbers<[1], [0], [0], [1], [0, 0, 1, 1], [], []>, precision = #tpu.contract_precision<fp32>} : vector<16x128xf32>, vector<128x8xf32>, vector<16x8xf32> -> vector<16x8xf32>
    %cst_8 = arith.constant 6.250000e-02 : f32
    %10 = vector.broadcast %cst_8 : f32 to vector<16x8xf32>
    %11 = arith.mulf %9, %10 : vector<16x8xf32>
    %cst_9 = arith.constant 9.99999997E-7 : f32
    %12 = vector.broadcast %cst_9 : f32 to vector<16x8xf32>
    %13 = arith.addf %11, %12 : vector<16x8xf32>
    %14 = math.rsqrt %13 : vector<16x8xf32>
    %cst_10 = arith.constant dense<0.000000e+00> : vector<16x128xf32>
    %15 = tpu.matmul %14, %2, %cst_10 {dimension_numbers = #tpu.dot_dimension_numbers<[1], [0], [0], [1], [0, 0, 1, 1], [], []>, precision = #tpu.contract_precision<fp32>} : vector<16x8xf32>, vector<8x128xf32>, vector<16x128xf32> -> vector<16x128xf32>
    %c0_11 = arith.constant 0 : index
    %c0_12 = arith.constant 0 : index
    %16 = vector.load %arg2[%c0_11, %c0_12] : memref<16x1xf32, #tpu.memory_space<vmem>>, vector<16x1xf32>
    %c0_13 = arith.constant 0 : index
    %c0_14 = arith.constant 0 : index
    %17 = vector.load %arg3[%c0_13, %c0_14] : memref<16x1xf32, #tpu.memory_space<vmem>>, vector<16x1xf32>
    %18 = arith.mulf %7, %15 : vector<16x128xf32>
    %19 = vector.broadcast %16 : vector<16x1xf32> to vector<16x128xf32>
    %20 = arith.mulf %18, %19 : vector<16x128xf32>
    %21 = vector.broadcast %17 : vector<16x1xf32> to vector<16x128xf32>
    %22 = arith.addf %20, %21 : vector<16x128xf32>
    %c0_15 = arith.constant 0 : index
    %c0_16 = arith.constant 0 : index
    %23 = vector.load %arg6[%c0_15, %c0_16] : memref<16x128xf32, #tpu.memory_space<vmem>>, vector<16x128xf32>
    tpu.vector_store %arg6[%c0_15, %c0_16], %22 {strides = array<i32>} : memref<16x128xf32, #tpu.memory_space<vmem>>, vector<16x128xf32>,
    return
  }
  func.func @transform_0(%arg0: i32) -> (i32, i32) {
    %c0_i32 = arith.constant 0 : i32
    %c0_i32_0 = arith.constant 0 : i32
    return %arg0, %c0_i32 : i32, i32
  }
  func.func @transform_1(%arg0: i32) -> (i32, i32) {
    %c0_i32 = arith.constant 0 : i32
    %c0_i32_0 = arith.constant 0 : i32
    return %arg0, %c0_i32 : i32, i32
  }
  func.func @transform_2(%arg0: i32) -> (i32, i32) {
    %c0_i32 = arith.constant 0 : i32
    %c0_i32_0 = arith.constant 0 : i32
    return %arg0, %c0_i32 : i32, i32
  }
  func.func @transform_3(%arg0: i32) -> (i32, i32) {
    %c0_i32 = arith.constant 0 : i32
    %c0_i32_0 = arith.constant 0 : i32
    %c0_i32_1 = arith.constant 0 : i32
    return %c0_i32, %c0_i32_0 : i32, i32
  }
  func.func @transform_4(%arg0: i32) -> (i32, i32) {
    %c0_i32 = arith.constant 0 : i32
    %c0_i32_0 = arith.constant 0 : i32
    %c0_i32_1 = arith.constant 0 : i32
    return %c0_i32, %c0_i32_0 : i32, i32
  }
  func.func @transform_5(%arg0: i32) -> (i32, i32) {
    %c0_i32 = arith.constant 0 : i32
    %c0_i32_0 = arith.constant 0 : i32
    return %arg0, %c0_i32 : i32, i32
  }
}

</mosaic_0001>

<bundles_post_ra>
// kernel: tpu_custom_call.1
= control target key start
LH: loop header
LB: loop body
LE: loop exit
PB: predicated region body
PF: predicated region fallthrough
CT: control target
= control target key end

     0   :  { %s4215_s0 = inlined_call_operand.vmem [shape: f32[16,128], index: 0, kind: input, shape index: {}]   ;;  %s4216_s1 = inlined_call_operand.vmem [shape: f32[16,1], index: 1, kind: input, shape index: {}]   ;;  %s4217_s2 = inlined_call_operand.vmem [shape: f32[16,1], index: 2, kind: input, shape index: {}]   ;;  %s4218_s3 = inlined_call_operand.vmem [shape: f32[128,8], index: 3, kind: input, shape index: {}]   ;;  %s4219_s4 = inlined_call_operand.vmem [shape: f32[8,128], index: 4, kind: input, shape index: {}]   ;;  %s4220_s5 = inlined_call_operand.hbm [shape: f32[16,128], index: 5, kind: output, shape index: {}]  }
   0x1   :  { %v23_v0 = vld [vmem:[%s4218_s3] sm:$0xff]  ;;  %v24_v1 = vld [vmem:[%s4218_s3 + $0x8] sm:$0xff]  ;;  %v25_v2 = vld [vmem:[%s4218_s3 + $0x10] sm:$0xff] }
   0x2   :  { %v41_v3 = vand.u32 4294901760, %v23_v0  ;;  %v44_v4 = vand.u32 4294901760, %v24_v1  ;;  %v26_v5 = vld [vmem:[%s4218_s3 + $0x18] sm:$0xff]  ;;  %v47_v6 = vand.u32 4294901760, %v25_v2  ;;  %v27_v7 = vld [vmem:[%s4218_s3 + $0x20] sm:$0xff]  ;;  %v28_v8 = vld [vmem:[%s4218_s3 + $0x28] sm:$0xff] }
   0x3   :  { %v50_v9 = vand.u32 4294901760, %v26_v5  ;;  %v53_v11 = vand.u32 4294901760, %v27_v7  ;;  %v56_v12 = vand.u32 4294901760, %v28_v8  ;;  %v3708_v14 = vld [vmem:[%s4218_s3 + $0x30] sm:$0xff]  ;;  %v3713_v15 = vld [vmem:[%s4218_s3 + $0x38] sm:$0xff]  ;;  %v3719_v16 = vld [vmem:[%s4215_s0] sm:$0xff] }
   0x4   :  { %v3701_v10 = vpack.c.bf16 %v44_v4, %v41_v3  ;;  %v3723_v17 = vand.u32 4294901760, %v3719_v16 }
   0x5   :  { %v3703_v13 = vpack.c.bf16 %v50_v9, %v47_v6 }
   0x6   :  { %3192 = vmatprep.subr.bf16.mxu0 %v3701_v10 }
   0x7   :  { %3194 = vmatpush3.bf16.msra.mxu0 %v3701_v10 }
   0x8   :  { %10 = vsyncpa [#allocation3], 0  ;;  %3196 = vmatprep.subr.bf16.mxu0 %v3703_v13  ;;  %v3726_v18 = vpack.c.bf16 %v56_v12, %v53_v11  ;;  %v59_v19 = vand.u32 4294901760, %v3708_v14  ;;  %v62_v20 = vand.u32 4294901760, %v3713_v15  ;;  %v31_v21 = vld [vmem:[%s4218_s3 + $0x40] sm:$0xff]  ;;  %v32_v22 = vld [vmem:[%s4218_s3 + $0x48] sm:$0xff]  ;;  %v3738_v23 = vsub.f32 %v3719_v16, %v3723_v17 }
   0x9   :  { %v3742_v25 = vsub.f32 %v23_v0, %v41_v3  ;;  %v65_v27 = vand.u32 4294901760, %v31_v21  ;;  %v68_v28 = vand.u32 4294901760, %v32_v22  ;;  %v3750_v29 = vld [vmem:[%s4215_s0 + $0x8] sm:$0xff]  ;;  %v33_v30 = vld [vmem:[%s4218_s3 + $0x50] sm:$0xff]  ;;  %v34_v31 = vld [vmem:[%s4218_s3 + $0x58] sm:$0xff]  ;;  %v3770_v36 = vsub.f32 %v24_v1, %v44_v4 }
   0xa   :  { %v123_v24 = vand.u32 4294901760, %v3738_v23  ;;  %v3745_v26 = vpack.c.bf16 %v62_v20, %v59_v19  ;;  %v35_v33 = vld [vmem:[%s4218_s3 + $0x60] sm:$0xff]  ;;  %v36_v34 = vld [vmem:[%s4218_s3 + $0x68] sm:$0xff]  ;;  %v37_v35 = vld [vmem:[%s4218_s3 + $0x70] sm:$0xff]  ;;  %v3778_v40 = vand.u32 4294901760, %v3750_v29  ;;  %v3780_v41 = vsub.f32 %v25_v2, %v47_v6 }
   0xb   :  { %3198 = vmatpush3.bf16.msra.mxu0 %v3703_v13  ;;  %v38_v37 = vld [vmem:[%s4218_s3 + $0x78] sm:$0xff]  ;;  %v144_v39 = vand.u32 4294901760, %v3742_v25  ;;  %v3783_v42 = vpack.c.bf16 %v68_v28, %v65_v27  ;;  %v71_v43 = vand.u32 4294901760, %v33_v30  ;;  %v74_v44 = vand.u32 4294901760, %v34_v31 }
   0xc   :  { %3200 = vmatprep.subr.bf16.mxu0 %v3726_v18  ;;  %v124_v32 = vsub.f32 %v3738_v23, %v123_v24  ;;  %v77_v45 = vand.u32 4294901760, %v35_v33  ;;  %v80_v46 = vand.u32 4294901760, %v36_v34  ;;  %v83_v47 = vand.u32 4294901760, %v37_v35 }
   0xd   :  { %v86_v48 = vand.u32 4294901760, %v38_v37  ;;  %v151_v49 = vand.u32 4294901760, %v3770_v36  ;;  %v3786_v50 = vsub.f32 %v26_v5, %v50_v9  ;;  %v3788_v51 = vsub.f32 %v27_v7, %v53_v11 }
   0xe   :  { %v125_v38 = vand.u32 4294901760, %v124_v32  ;;  %v145_v52 = vsub.f32 %v3742_v25, %v144_v39  ;;  %v3794_v53 = vsub.f32 %v3750_v29, %v3778_v40  ;;  %v158_v54 = vand.u32 4294901760, %v3780_v41 }
   0xf   :  { %3202 = vmatpush3.bf16.msra.mxu0 %v3726_v18  ;;  %v3797_v55 = vsub.f32 %v28_v8, %v56_v12  ;;  %v3800_v56 = vpack.c.bf16 %v74_v44, %v71_v43  ;;  %v3802_v57 = vpack.c.bf16 %v80_v46, %v77_v45  ;;  %v3804_v58 = vpack.c.bf16 %v86_v48, %v83_v47 }
  0x10   :  { %3204 = vmatprep.subr.bf16.mxu0 %v3745_v26  ;;  %2743 = vmatprep.mubr.f32.mxu0 %v125_v38  ;;  %v152_v59 = vsub.f32 %v3770_v36, %v151_v49  ;;  %v165_v60 = vand.u32 4294901760, %v3786_v50  ;;  %v172_v61 = vand.u32 4294901760, %v3788_v51  ;;  %v146_v62 = vand.u32 4294901760, %v145_v52 }
  0x11   :  { %v133_v63 = vand.u32 4294901760, %v3794_v53  ;;  %v159_v0 = vsub.f32 %v3780_v41, %v158_v54  ;;  %v179_v1 = vand.u32 4294901760, %v3797_v55  ;;  %v3815_v2 = vsub.f32 %v3708_v14, %v59_v19 }
  0x12   :  { %v3818_v3 = vsub.f32 %v3713_v15, %v62_v20  ;;  %v3820_v4 = vsub.f32 %v31_v21, %v65_v27  ;;  %v3822_v5 = vsub.f32 %v32_v22, %v68_v28  ;;  %v3824_v6 = vsub.f32 %v33_v30, %v71_v43 }
  0x13   :  { %3206 = vmatpush3.bf16.msra.mxu0 %v3745_v26  ;;  %v3826_v7 = vsub.f32 %v34_v31, %v74_v44  ;;  %v3828_v8 = vsub.f32 %v35_v33, %v77_v45  ;;  %v3830_v9 = vsub.f32 %v36_v34, %v80_v46  ;;  %v153_v11 = vand.u32 4294901760, %v152_v59 }
  0x14   :  { %3208 = vmatprep.subr.bf16.mxu0 %v3783_v42  ;;  %v166_v12 = vsub.f32 %v3786_v50, %v165_v60  ;;  %v3833_v14 = vsub.f32 %v37_v35, %v83_v47  ;;  %v3835_v19 = vsub.f32 %v38_v37, %v86_v48  ;;  %v134_v15 = vsub.f32 %v3794_v53, %v133_v63 }
  0x15   :  { %v160_v20 = vand.u32 4294901760, %v159_v0  ;;  %v173_v21 = vsub.f32 %v3788_v51, %v172_v61  ;;  %v180_v22 = vsub.f32 %v3797_v55, %v179_v1  ;;  %v186_v27 = vand.u32 4294901760, %v3815_v2 }
  0x16   :  { %v193_v28 = vand.u32 4294901760, %v3818_v3  ;;  %v200_v30 = vand.u32 4294901760, %v3820_v4  ;;  %v207_v31 = vand.u32 4294901760, %v3822_v5  ;;  %v214_v32 = vand.u32 4294901760, %v3824_v6 }
  0x17   :  { %3210 = vmatpush3.bf16.msra.mxu0 %v3783_v42  ;;  %v221_v33 = vand.u32 4294901760, %v3826_v7  ;;  %v228_v34 = vand.u32 4294901760, %v3828_v8  ;;  %v235_v35 = vand.u32 4294901760, %v3830_v9  ;;  %v242_v37 = vand.u32 4294901760, %v3833_v14 }
  0x18   :  { %3212 = vmatprep.subr.bf16.mxu0 %v3800_v56  ;;  %v249_v38 = vand.u32 4294901760, %v3835_v19  ;;  %v3854_v43 = vpack.c.bf16 %v151_v49, %v144_v39  ;;  %v3856_v44 = vpack.c.bf16 %v165_v60, %v158_v54  ;;  %v3859_v45 = vpack.c.bf16 %v153_v11, %v146_v62 }
  0x19   :  { %v3861_v46 = vpack.c.bf16 %v179_v1, %v172_v61  ;;  %v3863_v47 = vpack.c.bf16 %v193_v28, %v186_v27  ;;  %v3865_v48 = vpack.c.bf16 %v207_v31, %v200_v30  ;;  %v167_v52 = vand.u32 4294901760, %v166_v12 }
  0x1a   :  { %v3868_v59 = vpack.c.bf16 %v221_v33, %v214_v32  ;;  %v3870_v0 = vpack.c.bf16 %v235_v35, %v228_v34  ;;  %v3872_v39 = vpack.c.bf16 %v249_v38, %v242_v37  ;;  %v135_v49 = vand.u32 4294901760, %v134_v15 }
  0x1b   :  { %3214 = vmatpush3.bf16.msra.mxu0 %v3800_v56  ;;  %v174_v54 = vand.u32 4294901760, %v173_v21  ;;  %v181_v60 = vand.u32 4294901760, %v180_v22  ;;  %v3876_v61 = vpack.c.bf16 %v167_v52, %v160_v20  ;;  %v187_v62 = vsub.f32 %v3815_v2, %v186_v27 }
  0x1c   :  { %3216 = vmatprep.subr.bf16.mxu0 %v3802_v57  ;;  %v194_v1 = vsub.f32 %v3818_v3, %v193_v28  ;;  %v201_v21 = vsub.f32 %v3820_v4, %v200_v30  ;;  %v208_v20 = vsub.f32 %v3822_v5, %v207_v31  ;;  %v215_v22 = vsub.f32 %v3824_v6, %v214_v32 }
  0x1d   :  { %v3881_v11 = vpack.c.bf16 %v181_v60, %v174_v54  ;;  %v188_v12 = vand.u32 4294901760, %v187_v62  ;;  %v229_v54 = vsub.f32 %v3828_v8, %v228_v34  ;;  %v236_v32 = vsub.f32 %v3830_v9, %v235_v35 }
  0x1e   :  { %v195_v15 = vand.u32 4294901760, %v194_v1  ;;  %v202_v28 = vand.u32 4294901760, %v201_v21  ;;  %v209_v52 = vand.u32 4294901760, %v208_v20  ;;  %v216_v31 = vand.u32 4294901760, %v215_v22 }
  0x1f   :  { %3218 = vmatpush3.bf16.msra.mxu0 %v3802_v57  ;;  %v230_v62 = vand.u32 4294901760, %v229_v54  ;;  %v250_v34 = vsub.f32 %v3835_v19, %v249_v38  ;;  %v3923_v38 = vpack.c.bf16 %v3786_v50, %v3780_v41  ;;  %v3943_v41 = vpack.c.bf16 %v3822_v5, %v3820_v4 }
  0x20   :  { %3220 = vmatprep.subr.bf16.mxu0 %v3804_v58  ;;  %v3890_v27 = vpack.c.bf16 %v195_v15, %v188_v12  ;;  %v3896_v30 = vpack.c.bf16 %v209_v52, %v202_v28  ;;  %v243_v12 = vsub.f32 %v3833_v14, %v242_v37  ;;  %v3917_v37 = vpack.c.bf16 %v3770_v36, %v3742_v25 }
  0x21   :  { %v251_v35 = vand.u32 4294901760, %v250_v34  ;;  %v3931_v25 = vpack.c.bf16 %v3797_v55, %v3788_v51  ;;  %v3937_v36 = vpack.c.bf16 %v3818_v3, %v3815_v2  ;;  %v3949_v50 = vpack.c.bf16 %v3826_v7, %v3824_v6 }
  0x22   :  { %v244_v21 = vand.u32 4294901760, %v243_v12  ;;  %v3955_v51 = vpack.c.bf16 %v3830_v9, %v3828_v8  ;;  %v3961_v55 = vpack.c.bf16 %v3835_v19, %v3833_v14  ;;  %vm726_vm0 = vcmask 64512  }
  0x23   :  { %3222 = vmatpush3.bf16.msra.mxu0 %v3804_v58 }
  0x24   :  { %3224 = vmatprep.subr.bf16.mxu0 %v3859_v45  ;;  %v3911_v20 = vpack.c.bf16 %v251_v35, %v244_v21 }
  0x26   :  { %2744 = vmatmul.mubr.f32.vlgmr.msra.gmra.mrb[0].mxu0 %v135_v49  ;;  %v222_v49 = vsub.f32 %v3826_v7, %v221_v33  ;;  %v237_v33 = vand.u32 4294901760, %v236_v32 }
  0x27   :  { %3226 = vmatpush3.bf16.msra.mxu0 %v3859_v45  ;;  %2778 = vmatprep.mubr.f32.mxu0 %v3723_v17 }
  0x28   :  { %3228 = vmatprep.subr.bf16.mxu0 %v3876_v61  ;;  %v223_v60 = vand.u32 4294901760, %v222_v49  ;;  %v3907_v15 = vpack.c.bf16 %v237_v33, %v230_v62 }
  0x2a   :  { %v3901_v1 = vpack.c.bf16 %v223_v60, %v216_v31 }
  0x2b   :  { %3230 = vmatpush3.bf16.msra.mxu0 %v3876_v61 }
  0x2c   :  { %3232 = vmatprep.subr.bf16.mxu0 %v3881_v11 }
  0x2f   :  { %3234 = vmatpush3.bf16.msra.mxu0 %v3881_v11 }
  0x30   :  { %3236 = vmatprep.subr.bf16.mxu0 %v3890_v27 }
  0x33   :  { %3238 = vmatpush3.bf16.msra.mxu0 %v3890_v27 }
  0x34   :  { %3240 = vmatprep.subr.bf16.mxu0 %v3896_v30 }
  0x37   :  { %3242 = vmatpush3.bf16.msra.mxu0 %v3896_v30 }
  0x38   :  { %3244 = vmatprep.subr.bf16.mxu0 %v3901_v1 }
  0x3b   :  { %3246 = vmatpush3.bf16.msra.mxu0 %v3901_v1 }
  0x3c   :  { %3248 = vmatprep.subr.bf16.mxu0 %v3907_v15 }
  0x3f   :  { %3250 = vmatpush3.bf16.msra.mxu0 %v3907_v15 }
  0x40   :  { %3252 = vmatprep.subr.bf16.mxu0 %v3911_v20 }
  0x43   :  { %3254 = vmatpush3.bf16.msra.mxu0 %v3911_v20 }
  0x44   :  { %3256 = vmatprep.subr.bf16.mxu0 %v3917_v37 }
  0x46   :  { %2779 = vmatmul.mubr.f32.vlgmr.msra.gmra.mrb[0].mxu0 %v3778_v40 }
  0x47   :  { %3258 = vmatpush3.bf16.msra.mxu0 %v3917_v37  ;;  %2813 = vmatprep.mubr.f32.mxu0 %v3738_v23 }
  0x48   :  { %3260 = vmatprep.subr.bf16.mxu0 %v3923_v38 }
  0x4b   :  { %3262 = vmatpush3.bf16.msra.mxu0 %v3923_v38 }
  0x4c   :  { %3264 = vmatprep.subr.bf16.mxu0 %v3931_v25 }
  0x4f   :  { %3266 = vmatpush3.bf16.msra.mxu0 %v3931_v25 }
  0x50   :  { %3268 = vmatprep.subr.bf16.mxu0 %v3937_v36 }
  0x53   :  { %3270 = vmatpush3.bf16.msra.mxu0 %v3937_v36 }
  0x54   :  { %3272 = vmatprep.subr.bf16.mxu0 %v3943_v41 }
  0x57   :  { %3274 = vmatpush3.bf16.msra.mxu0 %v3943_v41 }
  0x58   :  { %3276 = vmatprep.subr.bf16.mxu0 %v3949_v50 }
  0x5b   :  { %3278 = vmatpush3.bf16.msra.mxu0 %v3949_v50 }
  0x5c   :  { %3280 = vmatprep.subr.bf16.mxu0 %v3955_v51 }
  0x5f   :  { %3282 = vmatpush3.bf16.msra.mxu0 %v3955_v51 }
  0x60   :  { %3284 = vmatprep.subr.bf16.mxu0 %v3961_v55 }
  0x63   :  { %3286 = vmatpush3.bf16.msra.mxu0 %v3961_v55 }
  0x64   :  { %3288 = vmatprep.subr.bf16.mxu0 %v3701_v10 }
  0x66   :  { %2814 = vmatmul.mubr.f32.vlgmr.msra.gmra.mrb[0].mxu0 %v3794_v53 }
  0x67   :  { %3290 = vmatpush3.bf16.msra.mxu0 %v3701_v10  ;;  %2848 = vmatprep.mubr.f32.mxu0 %v123_v24 }
  0x68   :  { %3292 = vmatprep.subr.bf16.mxu0 %v3703_v13 }
  0x6b   :  { %3294 = vmatpush3.bf16.msra.mxu0 %v3703_v13 }
  0x6c   :  { %3296 = vmatprep.subr.bf16.mxu0 %v3726_v18 }
  0x6f   :  { %3298 = vmatpush3.bf16.msra.mxu0 %v3726_v18 }
  0x70   :  { %3300 = vmatprep.subr.bf16.mxu0 %v3745_v26 }
  0x73   :  { %3302 = vmatpush3.bf16.msra.mxu0 %v3745_v26 }
  0x74   :  { %3304 = vmatprep.subr.bf16.mxu0 %v3783_v42 }
  0x77   :  { %3306 = vmatpush3.bf16.msra.mxu0 %v3783_v42 }
  0x78   :  { %3308 = vmatprep.subr.bf16.mxu0 %v3800_v56 }
  0x7b   :  { %3310 = vmatpush3.bf16.msra.mxu0 %v3800_v56 }
  0x7c   :  { %3312 = vmatprep.subr.bf16.mxu0 %v3802_v57 }
  0x7f   :  { %3314 = vmatpush3.bf16.msra.mxu0 %v3802_v57 }
  0x80   :  { %3316 = vmatprep.subr.bf16.mxu0 %v3804_v58 }
  0x83   :  { %3318 = vmatpush3.bf16.msra.mxu0 %v3804_v58 }
  0x84   :  { %3320 = vmatprep.subr.bf16.mxu0 %v3854_v43 }
  0x86   :  { %2849 = vmatmul.mubr.f32.vlgmr.msra.gmra.mrb[0].mxu0 %v133_v63 }
  0x87   :  { %3322 = vmatpush3.bf16.msra.mxu0 %v3854_v43  ;;  %2883 = vmatprep.mubr.f32.mxu0 %v3723_v17 }
  0x88   :  { %3324 = vmatprep.subr.bf16.mxu0 %v3856_v44 }
  0x8b   :  { %3326 = vmatpush3.bf16.msra.mxu0 %v3856_v44 }
  0x8c   :  { %3328 = vmatprep.subr.bf16.mxu0 %v3861_v46 }
  0x8f   :  { %3330 = vmatpush3.bf16.msra.mxu0 %v3861_v46 }
  0x90   :  { %3332 = vmatprep.subr.bf16.mxu0 %v3863_v47 }
  0x93   :  { %3334 = vmatpush3.bf16.msra.mxu0 %v3863_v47 }
  0x94   :  { %3336 = vmatprep.subr.bf16.mxu0 %v3865_v48 }
  0x97   :  { %3338 = vmatpush3.bf16.msra.mxu0 %v3865_v48 }
  0x98   :  { %3340 = vmatprep.subr.bf16.mxu0 %v3868_v59 }
  0x9b   :  { %3342 = vmatpush3.bf16.msra.mxu0 %v3868_v59 }
  0x9c   :  { %3344 = vmatprep.subr.bf16.mxu0 %v3870_v0 }
  0x9f   :  { %3346 = vmatpush3.bf16.msra.mxu0 %v3870_v0 }
  0xa0   :  { %3348 = vmatprep.subr.bf16.mxu0 %v3872_v39 }
  0xa3   :  { %3350 = vmatpush3.bf16.msra.mxu0 %v3872_v39 }
  0xa4   :  { %3352 = vmatprep.subr.bf16.mxu0 %v3701_v10 }
  0xa6   :  { %2884 = vmatmul.mubr.f32.vlgmr.msra.gmra.mrb[0].mxu0 %v3778_v40 }
  0xa7   :  { %3354 = vmatpush3.bf16.msra.mxu0 %v3701_v10  ;;  %2918 = vmatprep.mubr.f32.mxu0 %v3723_v17  ;;  %v39_v17 = vld [vmem:[%s4219_s4] sm:$0xff] }
  0xa8   :  { %3356 = vmatprep.subr.bf16.mxu0 %v3703_v13  ;;  %v4026_v23 = vand.u32 4294901760, %v39_v17 }
  0xaa   :  { %2921 = vmatprep.subr.mxu1 %v4026_v23  ;;  %v4033_v24 = vsub.f32 %v39_v17, %v4026_v23 }
  0xab   :  { %3358 = vmatpush3.bf16.msra.mxu0 %v3703_v13  ;;  %2922 = vmatpush3.msra.mxu1 %v4026_v23 }
  0xac   :  { %3360 = vmatprep.subr.bf16.mxu0 %v3726_v18  ;;  %v4036_v53 = vand.u32 4294901760, %v4033_v24 }
  0xaf   :  { %3362 = vmatpush3.bf16.msra.mxu0 %v3726_v18 }
  0xb0   :  { %3364 = vmatprep.subr.bf16.mxu0 %v3745_v26 }
  0xb3   :  { %3366 = vmatpush3.bf16.msra.mxu0 %v3745_v26 }
  0xb4   :  { %3368 = vmatprep.subr.bf16.mxu0 %v3783_v42 }
  0xb7   :  { %3370 = vmatpush3.bf16.msra.mxu0 %v3783_v42 }
  0xb8   :  { %3372 = vmatprep.subr.bf16.mxu0 %v3800_v56 }
  0xbb   :  { %3374 = vmatpush3.bf16.msra.mxu0 %v3800_v56 }
  0xbc   :  { %3376 = vmatprep.subr.bf16.mxu0 %v3802_v57 }
  0xbf   :  { %3378 = vmatpush3.bf16.msra.mxu0 %v3802_v57 }
  0xc0   :  { %3380 = vmatprep.subr.bf16.mxu0 %v3804_v58 }
  0xc3   :  { %3382 = vmatpush3.bf16.msra.mxu0 %v3804_v58 }
  0xc4   :  { %3161 = vmatprep.subr.mxu0 %v4026_v23 }
  0xc6   :  { %2919 = vmatmul.mubr.f32.vlgmr.msra.gmra.mrb[0].mxu0 %v3778_v40  ;;  %v823_v40 = vsub.f32 %v4033_v24, %v4036_v53 }
  0xc7   :  { %3162 = vmatpush3.msra.mxu0 %v4026_v23 }
  0xc8   :  { %v4040_v63 = vand.u32 4294901760, %v823_v40 }
  0xca   :  { %2926 = vmatprep.subr.mxu1 %v4040_v63  ;;  %3166 = vmatprep.subr.mxu0 %v4040_v63 }
 0x199   :  { %v2920_v2 = vpop.f32.mrb[0].mxu0 }
 0x19a   :  { %v725_v3 = vmul.f32 0.0625, %v2920_v2  ;;  %v714_v4 = vpop.f32.mrb[1].mxu0 }
 0x19b   :  { %v724_v5 = vmul.f32 0.0625, %v714_v4 }
 0x19c   :  { %v731_v6 = vsel %vm726_vm0, %v725_v3, 0 }
 0x19d   :  { %v809_v7 = vand.u32 4294901760, %v731_v6  ;;  %v728_v8 = vsel %vm726_vm0, %v724_v5, 0 }
 0x19e   :  { %v799_v9 = vand.u32 4294901760, %v728_v8 }
 0x19f   :  { %v810_v14 = vsub.f32 %v731_v6, %v809_v7 }
 0x1a0   :  { %v800_v19 = vsub.f32 %v728_v8, %v799_v9 }
 0x1a1   :  { %v811_v22 = vand.u32 4294901760, %v810_v14 }
 0x1a2   :  { %v801_v28 = vand.u32 4294901760, %v800_v19 }
 0x1a3   :  { %v812_v52 = vsub.f32 %v810_v14, %v811_v22 }
 0x1a4   :  { %v802_v49 = vsub.f32 %v800_v19, %v801_v28 }
 0x1a5   :  { %v813_v31 = vand.u32 4294901760, %v812_v52 }
 0x1a6   :  { %v803_v54 = vand.u32 4294901760, %v802_v49 }
 0x1a8   :  { %2923 = vmatprep.mubr.f32.mxu1 %v803_v54 }
 0x1a9   :  { %2924 = vmatmul.mubr.f32.vlgmr.msra.gmra.mrb[0].mxu1 %v813_v31 }
 0x1aa   :  { %2927 = vmatpush3.msra.mxu1 %v4040_v63  ;;  %2928 = vmatprep.mubr.f32.mxu1 %v799_v9 }
 0x1ab   :  { %2931 = vmatprep.subr.mxu1 %v4033_v24 }
 0x1b1   :  { %2929 = vmatmul.mubr.f32.vlgmr.msra.gmra.mrb[0].mxu1 %v809_v7 }
 0x1b2   :  { %2932 = vmatpush3.msra.mxu1 %v4033_v24  ;;  %2933 = vmatprep.mubr.f32.mxu1 %v800_v19 }
 0x1b3   :  { %2936 = vmatprep.subr.mxu1 %v4026_v23 }
 0x1b9   :  { %2934 = vmatmul.mubr.f32.vlgmr.msra.gmra.mrb[0].mxu1 %v810_v14 }
 0x1ba   :  { %2937 = vmatpush3.msra.mxu1 %v4026_v23  ;;  %2938 = vmatprep.mubr.f32.mxu1 %v801_v28 }
 0x1bb   :  { %2941 = vmatprep.subr.mxu1 %v4036_v53 }
 0x1c1   :  { %2939 = vmatmul.mubr.f32.vlgmr.msra.gmra.mrb[0].mxu1 %v811_v22 }
 0x1c2   :  { %2942 = vmatpush3.msra.mxu1 %v4036_v53  ;;  %2943 = vmatprep.mubr.f32.mxu1 %v799_v9 }
 0x1c3   :  { %2946 = vmatprep.subr.mxu1 %v4026_v23 }
 0x1c9   :  { %2944 = vmatmul.mubr.f32.vlgmr.msra.gmra.mrb[0].mxu1 %v809_v7 }
 0x1ca   :  { %2947 = vmatpush3.msra.mxu1 %v4026_v23  ;;  %2948 = vmatprep.mubr.f32.mxu1 %v799_v9 }
 0x1cb   :  { %3384 = vmatprep.subr.bf16.mxu1 %v3701_v10 }
 0x1d1   :  { %2949 = vmatmul.mubr.f32.vlgmr.msra.gmra.mrb[0].mxu1 %v809_v7 }
 0x1d2   :  { %3386 = vmatpush3.bf16.msra.mxu1 %v3701_v10 }
 0x1d3   :  { %3388 = vmatprep.subr.bf16.mxu1 %v3703_v13 }
 0x1d6   :  { %3390 = vmatpush3.bf16.msra.mxu1 %v3703_v13 }
 0x1d7   :  { %3392 = vmatprep.subr.bf16.mxu1 %v3726_v18 }
 0x1da   :  { %3394 = vmatpush3.bf16.msra.mxu1 %v3726_v18 }
 0x1db   :  { %3396 = vmatprep.subr.bf16.mxu1 %v3745_v26 }
 0x1de   :  { %3398 = vmatpush3.bf16.msra.mxu1 %v3745_v26 }
 0x1df   :  { %3400 = vmatprep.subr.bf16.mxu1 %v3783_v42 }
 0x1e2   :  { %3402 = vmatpush3.bf16.msra.mxu1 %v3783_v42 }
 0x1e3   :  { %3404 = vmatprep.subr.bf16.mxu1 %v3800_v56 }
 0x1e6   :  { %3406 = vmatpush3.bf16.msra.mxu1 %v3800_v56 }
 0x1e7   :  { %3408 = vmatprep.subr.bf16.mxu1 %v3802_v57 }
 0x1ea   :  { %3410 = vmatpush3.bf16.msra.mxu1 %v3802_v57 }
 0x1eb   :  { %3412 = vmatprep.subr.bf16.mxu1 %v3804_v58 }
 0x1ee   :  { %3414 = vmatpush3.bf16.msra.mxu1 %v3804_v58 }
 0x1ef   :  { %3416 = vmatprep.subr.bf16.mxu1 %v3859_v45 }
 0x2a4   :  { %v2950_v60 = vpop.f32.mrb[0].mxu1 }
 0x2a5   :  { %v4073_v32 = vsub.f32 %v3750_v29, %v2950_v60  ;;  %v1212_v62 = vpop.f32.mrb[1].mxu1 }
 0x2a6   :  { %v4076_v33 = vsub.f32 %v3719_v16, %v1212_v62 }
 0x2a7   :  { %v1225_v12 = vmul.f32 %v4073_v32, %v4073_v32 }
 0x2a8   :  { %v1224_v34 = vmul.f32 %v4076_v33, %v4076_v33 }
 0x2a9   :  { %v4082_v21 = vand.u32 4294901760, %v1225_v12 }
 0x2aa   :  { %v4084_v35 = vand.u32 4294901760, %v1224_v34 }
 0x2ab   :  { %v4087_v17 = vsub.f32 %v1225_v12, %v4082_v21 }
 0x2ac   :  { %v1308_v29 = vsub.f32 %v1224_v34, %v4084_v35 }
 0x2ad   :  { %v1319_v40 = vand.u32 4294901760, %v4087_v17 }
 0x2ae   :  { %v1309_v2 = vand.u32 4294901760, %v1308_v29 }
 0x2af   :  { %v1320_v16 = vsub.f32 %v4087_v17, %v1319_v40 }
 0x2b0   :  { %v1310_v3 = vsub.f32 %v1308_v29, %v1309_v2 }
 0x2b1   :  { %v1321_v5 = vand.u32 4294901760, %v1320_v16 }
 0x2b2   :  { %v1311_v4 = vand.u32 4294901760, %v1310_v3 }
 0x2b4   :  { %2983 = vmatprep.mubr.f32.mxu1 %v1311_v4 }
 0x2b5   :  { %2984 = vmatmul.mubr.f32.vlgmr.msra.gmra.mrb[2].mxu1 %v1321_v5 }
 0x2b6   :  { %3418 = vmatpush3.bf16.msra.mxu1 %v3859_v45  ;;  %3018 = vmatprep.mubr.f32.mxu1 %v4084_v35 }
 0x2b7   :  { %3420 = vmatprep.subr.bf16.mxu1 %v3876_v61 }
 0x2ba   :  { %3422 = vmatpush3.bf16.msra.mxu1 %v3876_v61 }
 0x2bb   :  { %3424 = vmatprep.subr.bf16.mxu1 %v3881_v11 }
 0x2be   :  { %3426 = vmatpush3.bf16.msra.mxu1 %v3881_v11 }
 0x2bf   :  { %3428 = vmatprep.subr.bf16.mxu1 %v3890_v27 }
 0x2c2   :  { %3430 = vmatpush3.bf16.msra.mxu1 %v3890_v27 }
 0x2c3   :  { %3432 = vmatprep.subr.bf16.mxu1 %v3896_v30 }
 0x2c6   :  { %3434 = vmatpush3.bf16.msra.mxu1 %v3896_v30 }
 0x2c7   :  { %3436 = vmatprep.subr.bf16.mxu1 %v3901_v1 }
 0x2ca   :  { %3438 = vmatpush3.bf16.msra.mxu1 %v3901_v1 }
 0x2cb   :  { %3440 = vmatprep.subr.bf16.mxu1 %v3907_v15 }
 0x2ce   :  { %3442 = vmatpush3.bf16.msra.mxu1 %v3907_v15 }
 0x2cf   :  { %3444 = vmatprep.subr.bf16.mxu1 %v3911_v20 }
 0x2d2   :  { %3446 = vmatpush3.bf16.msra.mxu1 %v3911_v20 }
 0x2d3   :  { %3448 = vmatprep.subr.bf16.mxu1 %v3917_v37 }
 0x2d5   :  { %3019 = vmatmul.mubr.f32.vlgmr.msra.gmra.mrb[2].mxu1 %v4082_v21 }
 0x2d6   :  { %3450 = vmatpush3.bf16.msra.mxu1 %v3917_v37  ;;  %3053 = vmatprep.mubr.f32.mxu1 %v1308_v29 }
 0x2d7   :  { %3452 = vmatprep.subr.bf16.mxu1 %v3923_v38 }
 0x2da   :  { %3454 = vmatpush3.bf16.msra.mxu1 %v3923_v38 }
 0x2db   :  { %3456 = vmatprep.subr.bf16.mxu1 %v3931_v25 }
 0x2de   :  { %3458 = vmatpush3.bf16.msra.mxu1 %v3931_v25 }
 0x2df   :  { %3460 = vmatprep.subr.bf16.mxu1 %v3937_v36 }
 0x2e2   :  { %3462 = vmatpush3.bf16.msra.mxu1 %v3937_v36 }
 0x2e3   :  { %3464 = vmatprep.subr.bf16.mxu1 %v3943_v41 }
 0x2e6   :  { %3466 = vmatpush3.bf16.msra.mxu1 %v3943_v41 }
 0x2e7   :  { %3468 = vmatprep.subr.bf16.mxu1 %v3949_v50 }
 0x2ea   :  { %3470 = vmatpush3.bf16.msra.mxu1 %v3949_v50 }
 0x2eb   :  { %3472 = vmatprep.subr.bf16.mxu1 %v3955_v51 }
 0x2ee   :  { %3474 = vmatpush3.bf16.msra.mxu1 %v3955_v51 }
 0x2ef   :  { %3476 = vmatprep.subr.bf16.mxu1 %v3961_v55 }
 0x2f2   :  { %3478 = vmatpush3.bf16.msra.mxu1 %v3961_v55 }
 0x2f3   :  { %3480 = vmatprep.subr.bf16.mxu1 %v3701_v10 }
 0x2f5   :  { %3054 = vmatmul.mubr.f32.vlgmr.msra.gmra.mrb[2].mxu1 %v4087_v17 }
 0x2f6   :  { %3482 = vmatpush3.bf16.msra.mxu1 %v3701_v10  ;;  %3088 = vmatprep.mubr.f32.mxu1 %v1309_v2 }
 0x2f7   :  { %3484 = vmatprep.subr.bf16.mxu1 %v3703_v13 }
 0x2fa   :  { %3486 = vmatpush3.bf16.msra.mxu1 %v3703_v13 }
 0x2fb   :  { %3488 = vmatprep.subr.bf16.mxu1 %v3726_v18 }
 0x2fe   :  { %3490 = vmatpush3.bf16.msra.mxu1 %v3726_v18 }
 0x2ff   :  { %3492 = vmatprep.subr.bf16.mxu1 %v3745_v26 }
 0x302   :  { %3494 = vmatpush3.bf16.msra.mxu1 %v3745_v26 }
 0x303   :  { %3496 = vmatprep.subr.bf16.mxu1 %v3783_v42 }
 0x306   :  { %3498 = vmatpush3.bf16.msra.mxu1 %v3783_v42 }
 0x307   :  { %3500 = vmatprep.subr.bf16.mxu1 %v3800_v56 }
 0x30a   :  { %3502 = vmatpush3.bf16.msra.mxu1 %v3800_v56 }
 0x30b   :  { %3504 = vmatprep.subr.bf16.mxu1 %v3802_v57 }
 0x30e   :  { %3506 = vmatpush3.bf16.msra.mxu1 %v3802_v57 }
 0x30f   :  { %3508 = vmatprep.subr.bf16.mxu1 %v3804_v58 }
 0x312   :  { %3510 = vmatpush3.bf16.msra.mxu1 %v3804_v58 }
 0x313   :  { %3512 = vmatprep.subr.bf16.mxu1 %v3854_v43 }
 0x315   :  { %3089 = vmatmul.mubr.f32.vlgmr.msra.gmra.mrb[2].mxu1 %v1319_v40 }
 0x316   :  { %3514 = vmatpush3.bf16.msra.mxu1 %v3854_v43  ;;  %3123 = vmatprep.mubr.f32.mxu1 %v4084_v35 }
 0x317   :  { %3516 = vmatprep.subr.bf16.mxu1 %v3856_v44 }
 0x31a   :  { %3518 = vmatpush3.bf16.msra.mxu1 %v3856_v44 }
 0x31b   :  { %3520 = vmatprep.subr.bf16.mxu1 %v3861_v46 }
 0x31e   :  { %3522 = vmatpush3.bf16.msra.mxu1 %v3861_v46 }
 0x31f   :  { %3524 = vmatprep.subr.bf16.mxu1 %v3863_v47 }
 0x322   :  { %3526 = vmatpush3.bf16.msra.mxu1 %v3863_v47 }
 0x323   :  { %3528 = vmatprep.subr.bf16.mxu1 %v3865_v48 }
 0x326   :  { %3530 = vmatpush3.bf16.msra.mxu1 %v3865_v48 }
 0x327   :  { %3532 = vmatprep.subr.bf16.mxu1 %v3868_v59 }
 0x32a   :  { %3534 = vmatpush3.bf16.msra.mxu1 %v3868_v59 }
 0x32b   :  { %3536 = vmatprep.subr.bf16.mxu1 %v3870_v0 }
 0x32e   :  { %3538 = vmatpush3.bf16.msra.mxu1 %v3870_v0 }
 0x32f   :  { %3540 = vmatprep.subr.bf16.mxu1 %v3872_v39 }
 0x332   :  { %3542 = vmatpush3.bf16.msra.mxu1 %v3872_v39 }
 0x333   :  { %3544 = vmatprep.subr.bf16.mxu1 %v3701_v10 }
 0x335   :  { %3124 = vmatmul.mubr.f32.vlgmr.msra.gmra.mrb[2].mxu1 %v4082_v21 }
 0x336   :  { %3546 = vmatpush3.bf16.msra.mxu1 %v3701_v10  ;;  %3158 = vmatprep.mubr.f32.mxu1 %v4084_v35  ;;  %v2411_v10 = vld [vmem:[%s4216_s1] sm:$0xff] }
 0x337   :  { %3548 = vmatprep.subr.bf16.mxu1 %v3703_v13 }
 0x33a   :  { %3550 = vmatpush3.bf16.msra.mxu1 %v3703_v13  ;;  %v2413_v13 = vld [vmem:[%s4217_s2] sm:$0xff] }
 0x33b   :  { %3552 = vmatprep.subr.bf16.mxu1 %v3726_v18 }
 0x33e   :  { %3554 = vmatpush3.bf16.msra.mxu1 %v3726_v18  ;;  %v3649_v18 = vmov 0  }
 0x33f   :  { %3556 = vmatprep.subr.bf16.mxu1 %v3745_v26  ;;  %3619 = vset.pattern.permute.xlu0 %v3649_v18 }
 0x340   :  { %3620 = vset.pattern.permute.xlu1 %v3649_v18  ;;  %2419 = vperm.xlu0 %3619, %v2411_v10  }
 0x341   :  { %2431 = vperm.xlu1 %3620, %v2413_v13  }
 0x342   :  { %3558 = vmatpush3.bf16.msra.mxu1 %v3745_v26  ;;  %v2412_v26 = vld [vmem:[%s4216_s1 + $0x8] sm:$0xff]  ;;  %s3650_s1 = smov [#allocation2]  }
 0x343   :  { %3560 = vmatprep.subr.bf16.mxu1 %v3783_v42 }
 0x344   :  { %2424 = vperm.xlu0 %3619, %v2412_v26  }
 0x346   :  { %3562 = vmatpush3.bf16.msra.mxu1 %v3783_v42  ;;  %v2414_v42 = vld [vmem:[%s4217_s2 + $0x8] sm:$0xff]  ;;  %s2448_s2 = sshll.u32 %s3650_s1, 4  ;;  %s2449_s2 = int_to_ptr.vmem [resolvable:$true] %s2448_s2 }
 0x347   :  { %3564 = vmatprep.subr.bf16.mxu1 %v3800_v56  ;;  %2436 = vperm.xlu1 %3620, %v2414_v42   ;;  %s3625_s11 = scalar_lea.vmem %s2449_s2, 256  ;;  %p3630_p1 = scmp.lt.s32.totalorder %s2449_s2, %s2449_s2 }
 0x348   :  { %p3626_p0 = scmp.ne.s32.totalorder %s2449_s2, %s3625_s11  ;;  %p3631_p2 = scmp.lt.s32.totalorder %s3625_s11, %s3625_s11 }
 0x34a   :  { %3566 = vmatpush3.bf16.msra.mxu1 %v3800_v56  ;;  %p3632_p3 = por %p3631_p2, %p3630_p1 }
 0x34b   :  { %3568 = vmatprep.subr.bf16.mxu1 %v3802_v57 }
 0x34c   :  { %p3633_p4 = pnand %p3632_p3, %p3626_p0 }
 0x34e   :  { %3570 = vmatpush3.bf16.msra.mxu1 %v3802_v57 }
 0x34f   :  { %3572 = vmatprep.subr.bf16.mxu1 %v3804_v58 }
 0x352   :  { %3574 = vmatpush3.bf16.msra.mxu1 %v3804_v58 }
 0x355   :  { %3159 = vmatmul.mubr.f32.vlgmr.msra.gmra.mrb[2].mxu1 %v4082_v21 }
 0x3bf   :  { %v2420_v38 = vpop.permute.xlu0 %2419 }
 0x3c0   :  { %v2432_v25 = vpop.permute.xlu1 %2431 }
 0x3c3   :  { %v2425_v51 = vpop.permute.xlu0 %2424 }
 0x428   :  { %v3160_v56 = vpop.f32.mrb[2].mxu1 }
 0x429   :  { %v1911_v57 = vmul.f32 0.0625, %v3160_v56  ;;  %v1900_v58 = vpop.f32.mrb[3].mxu1 }
 0x42a   :  { %v1910_v43 = vmul.f32 0.0625, %v1900_v58 }
 0x42b   :  { %v1913_v44 = vadd.f32 1e-06, %v1911_v57 }
 0x42c   :  { %v1912_v45 = vadd.f32 1e-06, %v1910_v43 }
 0x42d   :  { %3621 = vrsqrt.f32 %v1913_v44 }
 0x42e   :  { %3623 = vrsqrt.f32 %v1912_v45 }
 0x437   :  { %v3622_v46 = vpop.eup %3621 }
 0x438   :  { %v3624_v47 = vpop.eup %3623  ;;  %v1920_v48 = vsel %vm726_vm0, %v3622_v46, 0 }
 0x439   :  { %v1998_v59 = vand.u32 4294901760, %v1920_v48  ;;  %v1917_v0 = vsel %vm726_vm0, %v3624_v47, 0 }
 0x43a   :  { %v1988_v39 = vand.u32 4294901760, %v1917_v0 }
 0x43b   :  { %v1999_v61 = vsub.f32 %v1920_v48, %v1998_v59 }
 0x43c   :  { %v1989_v11 = vsub.f32 %v1917_v0, %v1988_v39 }
 0x43d   :  { %v2000_v27 = vand.u32 4294901760, %v1999_v61 }
 0x43e   :  { %v1990_v30 = vand.u32 4294901760, %v1989_v11 }
 0x43f   :  { %v2001_v1 = vsub.f32 %v1999_v61, %v2000_v27 }
 0x440   :  { %v1991_v15 = vsub.f32 %v1989_v11, %v1990_v30 }
 0x441   :  { %v2002_v37 = vand.u32 4294901760, %v2001_v1 }
 0x442   :  { %v1992_v20 = vand.u32 4294901760, %v1991_v15 }
 0x444   :  { %3163 = vmatprep.mubr.f32.mxu0 %v1992_v20 }
 0x445   :  { %3164 = vmatmul.mubr.f32.vlgmr.msra.gmra.mrb[2].mxu0 %v2002_v37 }
 0x446   :  { %3167 = vmatpush3.msra.mxu0 %v4040_v63  ;;  %3168 = vmatprep.mubr.f32.mxu0 %v1988_v39 }
 0x447   :  { %3171 = vmatprep.subr.mxu0 %v4033_v24 }
 0x44d   :  { %3169 = vmatmul.mubr.f32.vlgmr.msra.gmra.mrb[2].mxu0 %v1998_v59 }
 0x44e   :  { %3172 = vmatpush3.msra.mxu0 %v4033_v24  ;;  %3173 = vmatprep.mubr.f32.mxu0 %v1989_v11 }
 0x44f   :  { %3176 = vmatprep.subr.mxu0 %v4026_v23 }
 0x455   :  { %3174 = vmatmul.mubr.f32.vlgmr.msra.gmra.mrb[2].mxu0 %v1999_v61 }
 0x456   :  { %3177 = vmatpush3.msra.mxu0 %v4026_v23  ;;  %3178 = vmatprep.mubr.f32.mxu0 %v1990_v30 }
 0x457   :  { %3181 = vmatprep.subr.mxu0 %v4036_v53 }
 0x45d   :  { %3179 = vmatmul.mubr.f32.vlgmr.msra.gmra.mrb[2].mxu0 %v2000_v27 }
 0x45e   :  { %3182 = vmatpush3.msra.mxu0 %v4036_v53  ;;  %3183 = vmatprep.mubr.f32.mxu0 %v1988_v39  ;;  %v2437_v53 = vpop.permute.xlu1 %2436 }
 0x45f   :  { %3186 = vmatprep.subr.mxu0 %v4026_v23 }
 0x465   :  { %3184 = vmatmul.mubr.f32.vlgmr.msra.gmra.mrb[2].mxu0 %v1998_v59 }
 0x466   :  { %3187 = vmatpush3.msra.mxu0 %v4026_v23  ;;  %3188 = vmatprep.mubr.f32.mxu0 %v1988_v39 }
 0x46d   :  { %3189 = vmatmul.mubr.f32.vlgmr.msra.gmra.mrb[2].mxu0 %v1998_v59 }
 0x540   :  { %v3190_v36 = vpop.f32.mrb[2].mxu0 }
 0x541   :  { %v2416_v41 = vmul.f32 %v3190_v36, %v4073_v32  ;;  %v2401_v50 = vpop.f32.mrb[3].mxu0 }
 0x542   :  { %v2415_v55 = vmul.f32 %v2401_v50, %v4076_v33 }
 0x543   :  { %v2428_v24 = vmul.f32 %v2425_v51, %v2416_v41 }
 0x544   :  { %v2427_v63 = vmul.f32 %v2420_v38, %v2415_v55 }
 0x545   :  { %v2440_v6 = vadd.f32 %v2437_v53, %v2428_v24 }
 0x546   :  { %v2439_v7 = vadd.f32 %v2432_v25, %v2427_v63 }
 0x547   :  { %2442 = vst [vmem:[#allocation2 + $0x8] sm:$0xff] %v2440_v6 }
 0x548   :  { %2441 = vst [vmem:[#allocation2] sm:$0xff] %v2439_v7 }
 0x549   :  { %3636 = shalt.err (!%p3633_p4)
}
 0x54a   :  { %s3637_s14 = scalar_lea.hbm %s4220_s5, 256 }
 0x54b   :  { %p3638_p5 = scmp.ne.s32.totalorder %s4220_s5, %s3637_s14  ;;  %p3641_p6 = scmp.lt.u32.totalorder %s3637_s14, %s4220_s5 }
 0x54d   :  { %p3643_p7 = pnand %p3641_p6, %p3638_p5 }
 0x54f   :  { %3646 = shalt.err (!%p3643_p7)
}
 0x550   :  { %s3651_s19 = smov 128   ;;  %s3652_s20 = smov 8  }
 0x551   :  { %2454 = dma.vmem_to_hbm [thread:$0]  %s2449_s2, 256, %s4220_s5, [#allocation3], %s3651_s19, %s3651_s19, %s3652_s20  }
 0x552   :  { %3647 = dma.done.wait [#allocation3], 256  }
 0x553   :  { %3648 = vsyncadd [#allocation3], 4294967040 }
 0x554   :  { %2458 = vsyncpa [#allocation3], 1 }

</bundles_post_ra>
